<compile_context>
chip_gen: v5e
topology: v5e:2x2
jax: 0.10.0
libtpu: 0.0.40
codegen_flags: <defaults>
</compile_context>

<pallas_src>
import math
from functools import partial

import numpy as np
import jax
import jax.numpy as jnp
from jax.experimental import pallas as pl
from jax.experimental.pallas import tpu as pltpu


_VPU_MAX_C = 16  # below this, a 3xC matmul wastes the MXU; use broadcast FMAs


def _torgb_kernel(wmod_ref, bias_ref, x_ref, o_ref, *, clamp, use_mxu, C):
    """One (Bt, THW) tile of the modulated 1x1 conv + bias (+ clamp).

    wmod_ref: (Bt, 3, C)   VMEM, pre-modulated conv weight (input dtype)
    bias_ref: (3,)         SMEM, f32 conv bias
    x_ref:    (Bt, C, THW) VMEM, input tile in its native dtype (never upcast whole)
    o_ref:    (Bt, 3, THW) VMEM, output tile
    """
    if use_mxu:
        # Batched MXU contraction over C, f32 accumulation.
        y = jnp.einsum('boc,bct->bot', wmod_ref[...], x_ref[...],
                       preferred_element_type=jnp.float32)
    else:
        # Tiny C: 3*C broadcast multiply-adds on the VPU; skip MXU round-trips.
        w = wmod_ref[...].astype(jnp.float32)          # (Bt, 3, C)
        xv = x_ref[...]                                # (Bt, C, THW) native dtype
        y = w[:, :, 0:1] * xv[:, 0:1, :].astype(jnp.float32)
        for c in range(1, C):
            y = y + w[:, :, c:c + 1] * xv[:, c:c + 1, :].astype(jnp.float32)

    # Bias from three SMEM scalars, broadcast over the 3 output channels.
    ch = jax.lax.broadcasted_iota(jnp.int32, y.shape, 1)
    bias = jnp.where(ch == 0, bias_ref[0],
                     jnp.where(ch == 1, bias_ref[1], bias_ref[2]))
    y = y + bias
    if clamp is not None:
        y = jnp.clip(y, -clamp, clamp)
    o_ref[...] = y.astype(o_ref.dtype)


def _vmem_limit_bytes():
    """Generation-aware scoped-VMEM limit (v5e/v6e: 128 MiB phys, v7x: 64 MiB)."""
    cap = 64 * 1024 * 1024  # conservative fallback (v7x physical per-TC VMEM)
    try:
        info = pltpu.get_tpu_info()
        cap = int(getattr(info, "vmem_capacity_bytes", cap))
        if not cap or cap < (1 << 24):
            cap = 64 * 1024 * 1024
    except Exception:
        cap = 64 * 1024 * 1024
    return min(int(cap * 0.70), 100 * 1024 * 1024)


def _largest_divisor_leq(n, cap):
    cap = max(1, min(n, int(cap)))
    for d in range(cap, 0, -1):
        if n % d == 0:
            return d
    return 1


def _largest_128_divisor_leq(n, cap):
    """Largest divisor of n that is a multiple of 128 and <= cap, or None."""
    t = (min(int(cap), n) // 128) * 128
    while t >= 128:
        if n % t == 0:
            return t
        t -= 128
    return None


def _plan_tiling(B, C, HW, in_itemsize, out_itemsize, vmem_limit,
                 block_elems_cap=None):
    """Returns (Bt, THW, HW_pad)."""
    # VMEM per input-block byte: 2x double-buffered input, 2x output blocks,
    # one f32 epilogue/accumulator block, plus slack for w_mod/bias/misc.
    factor = 2.0 + (3.0 / C) * (2.0 * out_itemsize + 4.0) / in_itemsize
    budget_in = int(0.80 * vmem_limit / factor)            # bytes of ONE input block
    max_elems = max(128, budget_in // (C * in_itemsize))   # max Bt*THW per block
    if block_elems_cap is not None:                        # test-only override
        max_elems = max(128, min(max_elems, int(block_elems_cap)))

    if HW <= max_elems:
        THW, HW_pad = HW, HW
        Bt = _largest_divisor_leq(B, max(1, max_elems // HW))
    else:
        Bt = 1
        THW = _largest_128_divisor_leq(HW, max_elems)
        if THW is not None:
            HW_pad = HW
        else:
            # Rare fallback: HW has no 128-multiple divisor under budget; pad
            # the spatial axis to a multiple of 128 and tile the padded extent.
            HW_pad = ((HW + 127) // 128) * 128
            THW = _largest_128_divisor_leq(HW_pad, max_elems)

    # Keep >=2 grid steps on large tensors so v7x's two TensorCores both get
    # work (costs one extra ~0.35us step on single-TC chips: negligible).
    total_bytes = B * C * HW * in_itemsize
    if (B // Bt) * (HW_pad // THW) == 1 and total_bytes > (1 << 20):
        if B > 1:
            Bt = _largest_divisor_leq(B, B // 2)
        elif HW_pad % 256 == 0:
            THW = _largest_128_divisor_leq(HW_pad, HW_pad // 2)

    return Bt, THW, HW_pad


def to_rgb_forward(x, styles, params, activation_clamp=None, *,
                   _block_elems_cap=None):
    """ToRGB forward (prev_image=None path).

    x: (B, C, H, W) NCHW; styles: (B, style_dim). Returns (B, 3, H, W).
    """
    B, C, H, W = x.shape
    SD = styles.shape[1]
    HW = H * W
    in_itemsize = jnp.dtype(x.dtype).itemsize
    out_itemsize = in_itemsize

    fc_gain = 1.0 / math.sqrt(SD)        # FullyConnected weight gain
    weight_gain = 1.0 / math.sqrt(C)     # ToRGB weight_gain

    # --- Tiny per-batch affine + modulation, hoisted out of the tiled loop ---
    # (f32 math; only the small (B,3,C) modulated weight fed to the kernel is
    # downcast to the input dtype — accepted bf16 tolerance when x is bf16.)
    aff_w = params["affine_w"].astype(jnp.float32)                  # (C, SD)
    aff_b = params["affine_b"].astype(jnp.float32)                  # (C,)
    conv_w = params["conv_w"].reshape(3, C).astype(jnp.float32)     # (3, C)
    conv_b = params["conv_b"].reshape(3).astype(jnp.float32)        # (3,)

    s = styles.astype(jnp.float32) @ aff_w.T                        # (B, C)
    s = s * fc_gain + aff_b[None, :]
    s = s * weight_gain
    w_mod = (conv_w[None, :, :] * s[:, None, :]).astype(x.dtype)    # (B, 3, C)

    # --- Generation-aware tiling ---
    vmem_limit = _vmem_limit_bytes()
    Bt, THW, HW_pad = _plan_tiling(B, C, HW, in_itemsize, out_itemsize,
                                   vmem_limit, _block_elems_cap)

    x_flat = x.reshape(B, C, HW)
    if HW_pad != HW:   # rare fallback; typical shapes take the divisor path
        x_flat = jnp.pad(x_flat, ((0, 0), (0, 0), (0, HW_pad - HW)))

    grid = (B // Bt, HW_pad // THW)
    use_mxu = C > _VPU_MAX_C

    kernel = partial(_torgb_kernel, clamp=activation_clamp, use_mxu=use_mxu, C=C)

    cost = pl.CostEstimate(
        flops=2 * 3 * C * HW_pad * B,
        transcendentals=0,
        bytes_accessed=(B * C * HW_pad * in_itemsize        # x
                        + B * 3 * HW_pad * out_itemsize     # out
                        + B * 3 * C * in_itemsize           # w_mod
                        + 3 * 4))                           # bias

    out_flat = pl.pallas_call(
        kernel,
        out_shape=jax.ShapeDtypeStruct((B, 3, HW_pad), x.dtype),
        grid_spec=pltpu.PrefetchScalarGridSpec(
            num_scalar_prefetch=0,
            grid=grid,
            in_specs=[
                pl.BlockSpec((Bt, 3, C), lambda b, t: (b, 0, 0)),        # w_mod
                pl.BlockSpec(memory_space=pltpu.MemorySpace.SMEM),       # conv bias
                pl.BlockSpec((Bt, C, THW), lambda b, t: (b, 0, t)),      # x tile
            ],
            out_specs=pl.BlockSpec((Bt, 3, THW), lambda b, t: (b, 0, t)),
        ),
        compiler_params=pltpu.CompilerParams(
            dimension_semantics=("parallel", "parallel"),
            vmem_limit_bytes=vmem_limit),
        cost_estimate=cost,
    )(w_mod, conv_b, x_flat)

    if HW_pad != HW:
        out_flat = out_flat[:, :, :HW]

    # TODO(synk): prev_image branch (nvidia_ops.upsample2d with (1,3,3,1)
    # filter + residual add) not implemented; forward corresponds to
    # prev_image=None.
    return out_flat.reshape(B, 3, H, W)


def _reference(x, styles, params, activation_clamp=None):
    B, C, H, W = x.shape
    SD = styles.shape[1]
    s = styles @ params["affine_w"].T * (1.0 / math.sqrt(SD)) + params["affine_b"]
    s = s * (1.0 / math.sqrt(C))
    xm = x * s[:, :, None, None]
    cw = params["conv_w"].reshape(3, C)
    out = jnp.einsum("bchw,oc->bohw", xm, cw)
    out = out + params["conv_b"][None, :, None, None]
    if activation_clamp is not None:
        out = jnp.clip(out, -activation_clamp, activation_clamp)
    return out


def _make_params(key, C, SD):
    k_aw, k_cw = jax.random.split(key)
    return {
        "affine_w": jax.random.normal(k_aw, (C, SD), dtype=jnp.float32),  # FC weight
        "affine_b": jnp.ones((C,), dtype=jnp.float32),                    # bias_init=1.0
        "conv_w": jax.random.normal(k_cw, (3, C, 1, 1), dtype=jnp.float32),
        "conv_b": jnp.zeros((3,), dtype=jnp.float32),
    }


if __name__ == "__main__":
    key = jax.random.PRNGKey(0)

    def run_case(B, C, H, W, SD, clamp, cap, key):
        k1, k2, k3, key = jax.random.split(key, 4)
        x = jax.random.normal(k1, (B, C, H, W), dtype=jnp.float32)
        styles = jax.random.normal(k2, (B, SD), dtype=jnp.float32)
        params = _make_params(k3, C, SD)
        out = jax.block_until_ready(
            to_rgb_forward(x, styles, params, activation_clamp=clamp,
                           _block_elems_cap=cap))
        ref = _reference(x, styles, params, activation_clamp=clamp)
        np.testing.assert_allclose(np.asarray(out), np.asarray(ref),
                                   rtol=1e-5, atol=1e-5)
        return key

    # Case 1: small shapes, VPU path (C=4), single block, no clamp.
    key = run_case(2, 4, 16, 16, 32, None, None, key)
    # Case 2: same shapes, with activation clamp.
    key = run_case(2, 4, 16, 16, 32, 0.5, None, key)
    # Case 3: spatial tiling via divisor tiles (HW=1024 -> 4 tiles of 256), no pad.
    key = run_case(1, 4, 32, 32, 32, None, 256, key)
    # Case 4: MXU path (C=32), batch+spatial grid (2,2), with clamp.
    key = run_case(2, 32, 32, 32, 64, 0.8, 512, key)

    print("KERNEL_OK")
</pallas_src>

<mosaic_0001>
module attributes {stable_mosaic.version = 11 : i64} {
  func.func @_torgb_kernel(%arg0: i32, %arg1: i32, %arg2: memref<2x3x4xf32, #tpu.memory_space<vmem>>, %arg3: memref<3xf32, #tpu.memory_space<smem>>, %arg4: memref<2x4x256xf32, #tpu.memory_space<vmem>>, %arg5: memref<2x3x256xf32, #tpu.memory_space<vmem>>) attributes {dimension_semantics = [#tpu.dimension_semantics<parallel>, #tpu.dimension_semantics<parallel>], iteration_bounds = array<i64: 1, 1>, scalar_prefetch = 0 : i64, scratch_operands = 0 : i64, tpu.core_type = #tpu.core_type<tc>, window_params = [{transform_indices = @transform_0, window_bounds = array<i64: 2, 3, 4>}, {transform_indices = @transform_1, window_bounds = array<i64: 3>}, {transform_indices = @transform_2, window_bounds = array<i64: 2, 4, 256>}, {transform_indices = @transform_3, window_bounds = array<i64: 2, 3, 256>}]} {
    %c0 = arith.constant 0 : index
    %c0_0 = arith.constant 0 : index
    %c0_1 = arith.constant 0 : index
    %0 = vector.load %arg2[%c0, %c0_0, %c0_1] : memref<2x3x4xf32, #tpu.memory_space<vmem>>, vector<2x3x4xf32>
    %c0_2 = arith.constant 0 : index
    %c0_3 = arith.constant 0 : index
    %c0_4 = arith.constant 0 : index
    %1 = vector.load %arg4[%c0_2, %c0_3, %c0_4] : memref<2x4x256xf32, #tpu.memory_space<vmem>>, vector<2x4x256xf32>
    %2 = vector.extract_strided_slice %0 {offsets = [0, 0, 0], sizes = [2, 3, 1], strides = [1, 1, 1]} : vector<2x3x4xf32> to vector<2x3x1xf32>
    %3 = vector.extract_strided_slice %1 {offsets = [0, 0, 0], sizes = [2, 1, 256], strides = [1, 1, 1]} : vector<2x4x256xf32> to vector<2x1x256xf32>
    %4 = vector.broadcast %2 : vector<2x3x1xf32> to vector<2x3x256xf32>
    %5 = vector.broadcast %3 : vector<2x1x256xf32> to vector<2x3x256xf32>
    %6 = arith.mulf %4, %5 : vector<2x3x256xf32>
    %7 = vector.extract_strided_slice %0 {offsets = [0, 0, 1], sizes = [2, 3, 1], strides = [1, 1, 1]} : vector<2x3x4xf32> to vector<2x3x1xf32>
    %8 = vector.extract_strided_slice %1 {offsets = [0, 1, 0], sizes = [2, 1, 256], strides = [1, 1, 1]} : vector<2x4x256xf32> to vector<2x1x256xf32>
    %9 = vector.broadcast %7 : vector<2x3x1xf32> to vector<2x3x256xf32>
    %10 = vector.broadcast %8 : vector<2x1x256xf32> to vector<2x3x256xf32>
    %11 = arith.mulf %9, %10 : vector<2x3x256xf32>
    %12 = arith.addf %6, %11 : vector<2x3x256xf32>
    %13 = vector.extract_strided_slice %0 {offsets = [0, 0, 2], sizes = [2, 3, 1], strides = [1, 1, 1]} : vector<2x3x4xf32> to vector<2x3x1xf32>
    %14 = vector.extract_strided_slice %1 {offsets = [0, 2, 0], sizes = [2, 1, 256], strides = [1, 1, 1]} : vector<2x4x256xf32> to vector<2x1x256xf32>
    %15 = vector.broadcast %13 : vector<2x3x1xf32> to vector<2x3x256xf32>
    %16 = vector.broadcast %14 : vector<2x1x256xf32> to vector<2x3x256xf32>
    %17 = arith.mulf %15, %16 : vector<2x3x256xf32>
    %18 = arith.addf %12, %17 : vector<2x3x256xf32>
    %19 = vector.extract_strided_slice %0 {offsets = [0, 0, 3], sizes = [2, 3, 1], strides = [1, 1, 1]} : vector<2x3x4xf32> to vector<2x3x1xf32>
    %20 = vector.extract_strided_slice %1 {offsets = [0, 3, 0], sizes = [2, 1, 256], strides = [1, 1, 1]} : vector<2x4x256xf32> to vector<2x1x256xf32>
    %21 = vector.broadcast %19 : vector<2x3x1xf32> to vector<2x3x256xf32>
    %22 = vector.broadcast %20 : vector<2x1x256xf32> to vector<2x3x256xf32>
    %23 = arith.mulf %21, %22 : vector<2x3x256xf32>
    %24 = arith.addf %18, %23 : vector<2x3x256xf32>
    %25 = tpu.iota {dimensions = array<i32: 1>} : vector<2x3x256xi32>
    %c0_i32 = arith.constant 0 : i32
    %26 = vector.broadcast %c0_i32 : i32 to vector<2x3x256xi32>
    %27 = arith.cmpi eq, %25, %26 : vector<2x3x256xi32>
    %c0_5 = arith.constant 0 : index
    %28 = memref.load %arg3[%c0_5] : memref<3xf32, #tpu.memory_space<smem>>
    %c1_i32 = arith.constant 1 : i32
    %29 = vector.broadcast %c1_i32 : i32 to vector<2x3x256xi32>
    %30 = arith.cmpi eq, %25, %29 : vector<2x3x256xi32>
    %c1 = arith.constant 1 : index
    %31 = memref.load %arg3[%c1] : memref<3xf32, #tpu.memory_space<smem>>
    %c2 = arith.constant 2 : index
    %32 = memref.load %arg3[%c2] : memref<3xf32, #tpu.memory_space<smem>>
    %33 = vector.broadcast %31 : f32 to vector<2x3x256xf32>
    %34 = vector.broadcast %32 : f32 to vector<2x3x256xf32>
    %35 = arith.select %30, %33, %34 : vector<2x3x256xi1>, vector<2x3x256xf32>
    %36 = vector.broadcast %28 : f32 to vector<2x3x256xf32>
    %37 = arith.select %27, %36, %35 : vector<2x3x256xi1>, vector<2x3x256xf32>
    %38 = arith.addf %24, %37 : vector<2x3x256xf32>
    %c0_6 = arith.constant 0 : index
    %c0_7 = arith.constant 0 : index
    %c0_8 = arith.constant 0 : index
    %39 = vector.load %arg5[%c0_6, %c0_7, %c0_8] : memref<2x3x256xf32, #tpu.memory_space<vmem>>, vector<2x3x256xf32>
    tpu.vector_store %arg5[%c0_6, %c0_7, %c0_8], %38 {strides = array<i32>} : memref<2x3x256xf32, #tpu.memory_space<vmem>>, vector<2x3x256xf32>,
    return
  }
  func.func @transform_0(%arg0: i32, %arg1: i32) -> (i32, i32, i32) {
    %c0_i32 = arith.constant 0 : i32
    %c0_i32_0 = arith.constant 0 : i32
    %c0_i32_1 = arith.constant 0 : i32
    return %arg0, %c0_i32, %c0_i32_0 : i32, i32, i32
  }
  func.func @transform_1(%arg0: i32, %arg1: i32) -> i32 {
    %c0_i32 = arith.constant 0 : i32
    %c0_i32_0 = arith.constant 0 : i32
    return %c0_i32 : i32
  }
  func.func @transform_2(%arg0: i32, %arg1: i32) -> (i32, i32, i32) {
    %c0_i32 = arith.constant 0 : i32
    %c0_i32_0 = arith.constant 0 : i32
    return %arg0, %c0_i32, %arg1 : i32, i32, i32
  }
  func.func @transform_3(%arg0: i32, %arg1: i32) -> (i32, i32, i32) {
    %c0_i32 = arith.constant 0 : i32
    %c0_i32_0 = arith.constant 0 : i32
    return %arg0, %c0_i32, %arg1 : i32, i32, i32
  }
}

</mosaic_0001>

<bundles_post_ra>
// kernel: tpu_custom_call.1
= control target key start
LH: loop header
LB: loop body
LE: loop exit
PB: predicated region body
PF: predicated region fallthrough
CT: control target
= control target key end

     0   :  { %8 = vsyncpa [#allocation4], 0  ;;  %s304_s0 = inlined_call_operand.vmem [shape: f32[2,3,4], index: 0, kind: input, shape index: {}]   ;;  %s305_s1 = inlined_call_operand.vmem [shape: f32[3], index: 1, kind: input, shape index: {}]   ;;  %s306_s2 = inlined_call_operand.hbm [shape: f32[2,4,256], index: 2, kind: input, shape index: {}]   ;;  %s307_s3 = inlined_call_operand.vmem [shape: f32[2,3,256], index: 3, kind: output, shape index: {}]  }
   0x1   :  { %s17_s14 = sshll.u32 %s305_s1, 4  ;;  %s18_s14 = int_to_ptr.vmem [resolvable:$true] %s17_s14 }
   0x2   :  { %9 = vsyncpa [#allocation3], 0  ;;  %s25_s17 = sshll.u32 %s306_s2, 4  ;;  %s249_s18 = smov [#allocation2]   ;;  %s26_s17 = int_to_ptr.hbm [resolvable:$true] %s25_s17 }
   0x3   :  { %20 = dma.vmem_to_smem %s18_s14, 16, %s249_s18, [#allocation4]  }
   0x4   :  { %s250_s19 = smov [#allocation5]   ;;  %s251_s21 = smov 128  }
   0x5   :  { %s27_s20 = sshll.u32 %s250_s19, 4  ;;  %s252_s22 = smov 8   ;;  %s28_s20 = int_to_ptr.vmem [resolvable:$true] %s27_s20 }
   0x6   :  { %33 = dma.hbm_to_vmem [thread:$0]  %s26_s17, 256, %s28_s20, [#allocation3], %s251_s21, %s251_s21, %s252_s22  }
   0x7   :  { %245 = dma.done.wait [#allocation4], 16  }
   0x8   :  { %246 = vsyncadd [#allocation4], 4294967280 }
   0x9   :  { %247 = dma.done.wait [#allocation3], 256  }
   0xa   :  { %248 = vsyncadd [#allocation3], 4294967040 }
   0xb   :  { %42 = sfence }
   0xc   :  { %v43_v0 = vld [vmem:[%s304_s0] sm:$0x7]  ;;  %v253_v1 = vmov 1   ;;  %v254_v2 = vmov 0   ;;  %v255_v3 = vmov 2   ;;  %v256_v5 = vmov 3  }
   0xd   :  { %205 = vset.pattern.permute.xlu1 %v253_v1  ;;  %204 = vset.pattern.permute.xlu0 %v254_v2  ;;  %v44_v4 = vld [vmem:[%s304_s0 + $0x4] sm:$0x7]  ;;  %v46_v7 = vld [vmem:[#allocation5 + $0x8] sm:$0xff]  ;;  %v159_v21 = vlaneseq  ;;  %s289_s0 = sld [smem:[#allocation2 + $0x1]]  ;;  %vm181_vm2 = vcmask 1043456  }
   0xe   :  { %76 = vperm.xlu1 %205, %v43_v0   ;;  %49 = vperm.xlu0 %204, %v43_v0   ;;  %v45_v6 = vld [vmem:[#allocation5] sm:$0xff]  ;;  %v85_v14 = vperm.slane %v46_v7, 1  ;;  %v86_v15 = vperm.slane %v46_v7, 5  ;;  %v61_v16 = vperm.slane %v46_v7, 0  ;;  %v62_v17 = vperm.slane %v46_v7, 4  ;;  %s291_s25 = sld [smem:[#allocation2 + $0x2]] }
   0xf   :  { %206 = vset.pattern.permute.xlu2 %v255_v3  ;;  %v83_v8 = vperm.slane %v45_v6, 1  ;;  %v84_v9 = vperm.slane %v45_v6, 5  ;;  %v59_v11 = vperm.slane %v45_v6, 0  ;;  %v60_v12 = vperm.slane %v45_v6, 4  ;;  %s293_s26 = sld [smem:[#allocation2]] }
  0x10   :  { %104 = vperm.xlu2 %206, %v43_v0   ;;  %v111_v18 = vperm.slane %v45_v6, 2  ;;  %v112_v20 = vperm.slane %v45_v6, 6  ;;  %v93_v26 = vperm.slane %v85_v14, 1  ;;  %v94_v27 = vperm.slane %v86_v15, 1 }
  0x11   :  { %v91_v22 = vperm.slane %v83_v8, 1  ;;  %v92_v23 = vperm.slane %v84_v9, 1  ;;  %v67_v24 = vperm.slane %v59_v11, 0  ;;  %v68_v25 = vperm.slane %v60_v12, 0 }
  0x12   :  { %v69_v28 = vperm.slane %v61_v16, 0  ;;  %v70_v29 = vperm.slane %v62_v17, 0  ;;  %v119_v30 = vperm.slane %v111_v18, 2  ;;  %v120_v31 = vperm.slane %v112_v20, 2 }
  0x13   :  { %v113_v32 = vperm.slane %v46_v7, 2  ;;  %v114_v33 = vperm.slane %v46_v7, 6  ;;  %v160_v34 = vshrl.u32 %v159_v21, 7  ;;  %v141_v45 = vperm.slane %v46_v7, 3 }
  0x14   :  { %v142_v46 = vperm.slane %v46_v7, 7  ;;  %v139_v47 = vperm.slane %v45_v6, 3  ;;  %v140_v48 = vperm.slane %v45_v6, 7  ;;  %v166_v54 = vstv %s289_s0 }
  0x15   :  { %v121_v50 = vperm.slane %v113_v32, 2  ;;  %v122_v51 = vperm.slane %v114_v33, 2  ;;  %vm163_vm0 = vcmp.eq.s32.totalorder %v160_v34, 1  ;;  %v167_v55 = vstv %s291_s25 }
  0x16   :  { %80 = vperm.xlu1 %205, %v44_v4   ;;  %54 = vperm.xlu0 %204, %v44_v4   ;;  %v149_v60 = vperm.slane %v141_v45, 3  ;;  %v150_v61 = vperm.slane %v142_v46, 3  ;;  %v147_v62 = vperm.slane %v139_v47, 3  ;;  %v148_v63 = vperm.slane %v140_v48, 3 }
  0x17   :  { %vm161_vm1 = vcmp.eq.s32.totalorder %v160_v34, 0  ;;  %v168_v2 = vsel %vm163_vm0, %v166_v54, %v167_v55  ;;  %v169_v3 = vstv %s293_s26 }
  0x18   :  { %108 = vperm.xlu2 %206, %v44_v4   ;;  %v170_v14 = vsel %vm161_vm1, %v169_v3, %v168_v2 }
  0x1e   :  { %208 = vset.pattern.permute.xlu1 %v256_v5  ;;  %207 = vset.pattern.permute.xlu0 %v256_v5 }
  0x1f   :  { %136 = vperm.xlu1 %208, %v44_v4   ;;  %132 = vperm.xlu0 %207, %v43_v0  }
  0x6a   :  { %v105_v19 = vpop.permute.xlu2 %104 }
  0x6b   :  { %v123_v49 = vmul.f32 %v119_v30, %v105_v19  ;;  %v124_v52 = vmul.f32 %v120_v31, %v105_v19 }
  0x72   :  { %v109_v53 = vpop.permute.xlu2 %108 }
  0x73   :  { %v125_v0 = vmul.f32 %v121_v50, %v109_v53  ;;  %v126_v1 = vmul.f32 %v122_v51, %v109_v53 }
  0x80   :  { %v77_v10 = vpop.permute.xlu1 %76  ;;  %v50_v13 = vpop.permute.xlu0 %49 }
  0x81   :  { %v95_v35 = vmul.f32 %v91_v22, %v77_v10  ;;  %v96_v36 = vmul.f32 %v92_v23, %v77_v10  ;;  %v71_v37 = vmul.f32 %v67_v24, %v50_v13  ;;  %v72_v38 = vmul.f32 %v68_v25, %v50_v13 }
  0x83   :  { %v99_v56 = vadd.f32 %v95_v35, %v71_v37  ;;  %v100_v57 = vadd.f32 %v96_v36, %v72_v38 }
  0x85   :  { %v127_v7 = vadd.f32 %v123_v49, %v99_v56  ;;  %v128_v8 = vadd.f32 %v124_v52, %v100_v57 }
  0x88   :  { %v81_v39 = vpop.permute.xlu1 %80  ;;  %v55_v40 = vpop.permute.xlu0 %54 }
  0x89   :  { %v97_v41 = vmul.f32 %v93_v26, %v81_v39  ;;  %v98_v42 = vmul.f32 %v94_v27, %v81_v39  ;;  %v73_v43 = vmul.f32 %v69_v28, %v55_v40  ;;  %v74_v44 = vmul.f32 %v70_v29, %v55_v40 }
  0x8b   :  { %v101_v58 = vadd.f32 %v97_v41, %v73_v43  ;;  %v102_v59 = vadd.f32 %v98_v42, %v74_v44 }
  0x8d   :  { %v129_v5 = vadd.f32 %v125_v0, %v101_v58  ;;  %v130_v6 = vadd.f32 %v126_v1, %v102_v59 }
  0x91   :  { %v137_v4 = vpop.permute.xlu1 %136  ;;  %v133_v9 = vpop.permute.xlu0 %132 }
  0x92   :  { %v153_v10 = vmul.f32 %v149_v60, %v137_v4  ;;  %v154_v11 = vmul.f32 %v150_v61, %v137_v4  ;;  %v151_v12 = vmul.f32 %v147_v62, %v133_v9  ;;  %v152_v13 = vmul.f32 %v148_v63, %v133_v9 }
  0x94   :  { %v157_v15 = vadd.f32 %v153_v10, %v129_v5  ;;  %v158_v16 = vadd.f32 %v154_v11, %v130_v6  ;;  %v155_v17 = vadd.f32 %v151_v12, %v127_v7  ;;  %v156_v18 = vadd.f32 %v152_v13, %v128_v8 }
  0x96   :  { %v174_v19 = vadd.f32 %v170_v14, %v158_v16  ;;  %v172_v20 = vadd.f32 %v170_v14, %v156_v18  ;;  %v173_v21 = vadd.f32 %v170_v14, %v157_v15  ;;  %v171_v23 = vadd.f32 %v170_v14, %v155_v17 }
  0x98   :  { %v180_v22 = vrot.slane %v174_v19, 4  ;;  %v179_v24 = vrot.slane %v172_v20, 4 }
  0x9a   :  { %v183_v25 = vsel %vm181_vm2, %v173_v21, %v180_v22  ;;  %v182_v26 = vsel %vm181_vm2, %v171_v23, %v179_v24 }
  0x9b   :  { %187 = vst [vmem:[%s307_s3 + $0x8] sm:$0x77] %v183_v25 }
  0x9c   :  { %186 = vst [vmem:[%s307_s3] sm:$0x77] %v182_v26 }
  0x9d   :  { %192 = vsyncpa [#allocation3], 1 }
  0x9e   :  { %193 = vsyncpa [#allocation4], 1 }

</bundles_post_ra>
